<compile_context>
chip_gen: v7x
topology: tpu7x:2x2x1
jax: 0.10.0
libtpu: 0.0.40
codegen_flags: <defaults>
</compile_context>

<pallas_src>
import functools

import jax
import jax.numpy as jnp
from jax.experimental import pallas as pl
from jax.experimental.pallas import tpu as pltpu

_LANES = 128
_SUBLANES = 8


def _bce_blur_kernel(pred_ref, true_ref, out_ref, *, alpha, n, block_elems,
                     needs_mask):
    x = pred_ref[...].astype(jnp.float32)
    y = true_ref[...].astype(jnp.float32)
    rows, lanes = x.shape

    # BCEWithLogitsLoss(reduction='none'), numerically stable form:
    #   loss = max(x, 0) - x*y + log(1 + exp(-|x|))
    e = jnp.exp(-jnp.abs(x))  # reused below for the sigmoid
    loss = jnp.maximum(x, 0.0) - x * y + jnp.log1p(e)

    # sigmoid(x) from the already-computed exp(-|x|):
    #   x >= 0: 1 / (1 + e)      x < 0: e / (1 + e) = 1 - 1/(1 + e)
    inv = pl.reciprocal(1.0 + e, approx=True)
    p = jnp.where(x >= 0.0, inv, 1.0 - inv)

    dx = p - y
    alpha_factor = 1.0 - jnp.exp((dx - 1.0) / (alpha + 0.0001))
    loss = loss * alpha_factor

    if needs_mask:
        # Only needed when the padded tile shape holds more than n elements;
        # zero out the contribution of padded positions.
        base = pl.program_id(0) * block_elems
        row_ids = jax.lax.broadcasted_iota(jnp.int32, (rows, lanes), 0)
        lane_ids = jax.lax.broadcasted_iota(jnp.int32, (rows, lanes), 1)
        idx = base + row_ids * lanes + lane_ids
        loss = jnp.where(idx < n, loss, 0.0)

    # Per-block partial sum folded down to an (8, 128) tile: reshape groups whole
    # (8,128) vreg tiles (layout-preserving) and the axis-0 sum is pure VALU adds.
    out_ref[...] = loss.reshape(rows // _SUBLANES, _SUBLANES, lanes).sum(axis=0)


def bce_blur_with_logits_loss(pred, true, alpha=0.05, block_rows=2048):
    """Mean of BCEWithLogits(pred, true) * blur-factor over all elements."""
    assert pred.shape == true.shape
    n = pred.size

    rows = pl.cdiv(n, _LANES)
    # Clamp the tile height for small inputs; keep it a multiple of 8 sublanes.
    block_rows = max(_SUBLANES, min(block_rows, pl.cdiv(rows, _SUBLANES) * _SUBLANES))
    rows_p = pl.cdiv(rows, block_rows) * block_rows
    num_blocks = rows_p // block_rows
    padded_n = rows_p * _LANES
    needs_mask = padded_n != n

    p_flat = pred.reshape(-1)
    t_flat = true.reshape(-1)
    if needs_mask:
        p_flat = jnp.pad(p_flat, (0, padded_n - n))
        t_flat = jnp.pad(t_flat, (0, padded_n - n))
    p2 = p_flat.reshape(rows_p, _LANES)
    t2 = t_flat.reshape(rows_p, _LANES)

    partials = pl.pallas_call(
        functools.partial(
            _bce_blur_kernel,
            alpha=float(alpha),
            n=n,
            block_elems=block_rows * _LANES,
            needs_mask=needs_mask,
        ),
        out_shape=jax.ShapeDtypeStruct((num_blocks * _SUBLANES, _LANES),
                                       jnp.float32),
        grid=(num_blocks,),
        in_specs=[
            pl.BlockSpec((block_rows, _LANES), lambda i: (i, 0)),
            pl.BlockSpec((block_rows, _LANES), lambda i: (i, 0)),
        ],
        out_specs=pl.BlockSpec((_SUBLANES, _LANES), lambda i: (i, 0)),
        compiler_params=pltpu.CompilerParams(
            dimension_semantics=("parallel",),
        ),
    )(p2, t2)

    total = jnp.sum(partials)
    return (total / jnp.float32(n)).astype(pred.dtype)


def _reference(pred, true, alpha=0.05):
    x = pred.astype(jnp.float32)
    y = true.astype(jnp.float32)
    loss = jnp.maximum(x, 0.0) - x * y + jnp.log1p(jnp.exp(-jnp.abs(x)))
    p = jax.nn.sigmoid(x)
    dx = p - y
    af = 1.0 - jnp.exp((dx - 1.0) / (alpha + 0.0001))
    return jnp.mean(loss * af)


if __name__ == "__main__":
    key = jax.random.PRNGKey(0)
    k1, k2 = jax.random.split(key)
    # NCHW-shaped logits and binary targets
    pred = jax.random.normal(k1, (2, 4, 16, 16), dtype=jnp.float32)
    true = jax.random.bernoulli(k2, 0.3, (2, 4, 16, 16)).astype(jnp.float32)

    out = bce_blur_with_logits_loss(pred, true, alpha=0.05)
    out = jax.block_until_ready(out)

    ref = _reference(pred, true, alpha=0.05)
    # Tolerance loosened slightly vs 1e-5 because the in-kernel sigmoid uses the
    # EUP approximate reciprocal (pl.reciprocal(approx=True)).
    assert jnp.allclose(out, ref, atol=1e-3, rtol=1e-3), (out, ref)

    print("KERNEL_OK")
</pallas_src>

<mosaic_0001>
module attributes {stable_mosaic.version = 11 : i64} {
  func.func @_bce_blur_kernel(%arg0: i32, %arg1: memref<16x128xf32, #tpu.memory_space<vmem>>, %arg2: memref<16x128xf32, #tpu.memory_space<vmem>>, %arg3: memref<8x128xf32, #tpu.memory_space<vmem>>) attributes {dimension_semantics = [#tpu.dimension_semantics<parallel>], iteration_bounds = array<i64: 1>, scalar_prefetch = 0 : i64, scratch_operands = 0 : i64, tpu.core_type = #tpu.core_type<tc>, window_params = [{transform_indices = @transform_0, window_bounds = array<i64: 16, 128>}, {transform_indices = @transform_1, window_bounds = array<i64: 16, 128>}, {transform_indices = @transform_2, window_bounds = array<i64: 8, 128>}]} {
    %c0 = arith.constant 0 : index
    %c0_0 = arith.constant 0 : index
    %0 = vector.load %arg1[%c0, %c0_0] : memref<16x128xf32, #tpu.memory_space<vmem>>, vector<16x128xf32>
    %c0_1 = arith.constant 0 : index
    %c0_2 = arith.constant 0 : index
    %1 = vector.load %arg2[%c0_1, %c0_2] : memref<16x128xf32, #tpu.memory_space<vmem>>, vector<16x128xf32>
    %2 = math.absf %0 : vector<16x128xf32>
    %cst = arith.constant 0.000000e+00 : f32
    %3 = vector.broadcast %cst : f32 to vector<16x128xf32>
    %4 = arith.subf %3, %2 : vector<16x128xf32>
    %5 = math.exp %4 : vector<16x128xf32>
    %cst_3 = arith.constant 0.000000e+00 : f32
    %6 = vector.broadcast %cst_3 : f32 to vector<16x128xf32>
    %7 = arith.maximumf %0, %6 : vector<16x128xf32>
    %8 = arith.mulf %0, %1 : vector<16x128xf32>
    %9 = arith.subf %7, %8 : vector<16x128xf32>
    %10 = math.log1p %5 : vector<16x128xf32>
    %11 = arith.addf %9, %10 : vector<16x128xf32>
    %cst_4 = arith.constant 1.000000e+00 : f32
    %12 = vector.broadcast %cst_4 : f32 to vector<16x128xf32>
    %13 = arith.addf %12, %5 : vector<16x128xf32>
    %14 = tpu.reciprocal %13 {approx = true} : vector<16x128xf32> -> vector<16x128xf32>
    %cst_5 = arith.constant 0.000000e+00 : f32
    %15 = vector.broadcast %cst_5 : f32 to vector<16x128xf32>
    %16 = arith.cmpf oge, %0, %15 : vector<16x128xf32>
    %cst_6 = arith.constant 1.000000e+00 : f32
    %17 = vector.broadcast %cst_6 : f32 to vector<16x128xf32>
    %18 = arith.subf %17, %14 : vector<16x128xf32>
    %19 = arith.select %16, %14, %18 : vector<16x128xi1>, vector<16x128xf32>
    %20 = arith.subf %19, %1 : vector<16x128xf32>
    %cst_7 = arith.constant 1.000000e+00 : f32
    %21 = vector.broadcast %cst_7 : f32 to vector<16x128xf32>
    %22 = arith.subf %20, %21 : vector<16x128xf32>
    %cst_8 = arith.constant 5.010000e-02 : f32
    %23 = vector.broadcast %cst_8 : f32 to vector<16x128xf32>
    %24 = arith.divf %22, %23 : vector<16x128xf32>
    %25 = math.exp %24 : vector<16x128xf32>
    %cst_9 = arith.constant 1.000000e+00 : f32
    %26 = vector.broadcast %cst_9 : f32 to vector<16x128xf32>
    %27 = arith.subf %26, %25 : vector<16x128xf32>
    %28 = arith.mulf %11, %27 : vector<16x128xf32>
    %29 = vector.shape_cast %28 : vector<16x128xf32> to vector<2x8x128xf32>
    %cst_10 = arith.constant dense<0.000000e+00> : vector<8x128xf32>
    %30 = vector.multi_reduction <add>, %29, %cst_10 [0] : vector<2x8x128xf32> to vector<8x128xf32>
    %c0_11 = arith.constant 0 : index
    %c0_12 = arith.constant 0 : index
    %31 = vector.load %arg3[%c0_11, %c0_12] : memref<8x128xf32, #tpu.memory_space<vmem>>, vector<8x128xf32>
    tpu.vector_store %arg3[%c0_11, %c0_12], %30 {strides = array<i32>} : memref<8x128xf32, #tpu.memory_space<vmem>>, vector<8x128xf32>,
    return
  }
  func.func @transform_0(%arg0: i32) -> (i32, i32) {
    %c0_i32 = arith.constant 0 : i32
    %c0_i32_0 = arith.constant 0 : i32
    return %arg0, %c0_i32 : i32, i32
  }
  func.func @transform_1(%arg0: i32) -> (i32, i32) {
    %c0_i32 = arith.constant 0 : i32
    %c0_i32_0 = arith.constant 0 : i32
    return %arg0, %c0_i32 : i32, i32
  }
  func.func @transform_2(%arg0: i32) -> (i32, i32) {
    %c0_i32 = arith.constant 0 : i32
    %c0_i32_0 = arith.constant 0 : i32
    return %arg0, %c0_i32 : i32, i32
  }
}

</mosaic_0001>

<bundles_post_ra>
// kernel: tpu_custom_call.1
= control target key start
LH: loop header
LB: loop body
LE: loop exit
PB: predicated region body
PF: predicated region fallthrough
CT: control target
= control target key end

     0   :  { %7 = vsyncpa [#allocation3], 0  ;;  %s272_s0 = inlined_call_operand.hbm [shape: f32[16,128], index: 0, kind: input, shape index: {}]   ;;  %s273_s1 = inlined_call_operand.hbm [shape: f32[16,128], index: 1, kind: input, shape index: {}]   ;;  %s274_s2 = inlined_call_operand.hbm [shape: f32[8,128], index: 2, kind: output, shape index: {}]  }
   0x1   :  { %8 = vsyncpa [#allocation6], 0 }
   0x2   :  { %9 = vsyncpa [#allocation4], 0  ;;  %s216_s9 = smov [#allocation2]   ;;  %s144_s13 = scalar_lea.hbm %s272_s0, 256 }
   0x3   :  { %s15_s10 = sshll.u32 %s216_s9, 4  ;;  %p145_p0 = scmp.ne.s32.totalorder %s272_s0, %s144_s13  ;;  %s16_s10 = int_to_ptr.vmem [resolvable:$true] %s15_s10 }
   0x4   :  { %p148_p1 = scmp.lt.u32.totalorder %s144_s13, %s272_s0 }
   0x6   :  { %p150_p2 = pnand %p148_p1, %p145_p0 }
   0x8   :  { %153 = shalt.err (!%p150_p2)
}
   0x9   :  { %s154_s18 = scalar_lea.vmem %s16_s10, 256  ;;  %p159_p4 = scmp.lt.s32.totalorder %s16_s10, %s16_s10 }
   0xa   :  { %p155_p3 = scmp.ne.s32.totalorder %s16_s10, %s154_s18  ;;  %p160_p5 = scmp.lt.s32.totalorder %s154_s18, %s154_s18 }
   0xc   :  { %p161_p6 = por %p160_p5, %p159_p4 }
   0xe   :  { %p162_p7 = pnand %p161_p6, %p155_p3 }
  0x10   :  { %165 = shalt.err (!%p162_p7)
}
  0x11   :  { %s217_s19 = smov 128   ;;  %s218_s20 = smov 8  }
  0x12   :  { %21 = dma.hbm_to_vmem [thread:$0]  %s272_s0, 256, %s16_s10, [#allocation3], %s217_s19, %s217_s19, %s218_s20  }
  0x13   :  { %s219_s23 = smov [#allocation5]   ;;  %s166_s27 = scalar_lea.hbm %s273_s1, 256 }
  0x14   :  { %s27_s24 = sshll.u32 %s219_s23, 4  ;;  %p167_p8 = scmp.ne.s32.totalorder %s273_s1, %s166_s27  ;;  %s28_s24 = int_to_ptr.vmem [resolvable:$true] %s27_s24 }
  0x15   :  { %p170_p9 = scmp.lt.u32.totalorder %s166_s27, %s273_s1 }
  0x17   :  { %p172_p10 = pnand %p170_p9, %p167_p8 }
  0x19   :  { %175 = shalt.err (!%p172_p10)
}
  0x1a   :  { %s176_s4 = scalar_lea.vmem %s28_s24, 256  ;;  %p181_p12 = scmp.lt.s32.totalorder %s28_s24, %s28_s24 }
  0x1b   :  { %p177_p11 = scmp.ne.s32.totalorder %s28_s24, %s176_s4  ;;  %p182_p13 = scmp.lt.s32.totalorder %s176_s4, %s176_s4 }
  0x1d   :  { %p183_p0 = por %p182_p13, %p181_p12 }
  0x1f   :  { %p184_p1 = pnand %p183_p0, %p177_p11 }
  0x21   :  { %187 = shalt.err (!%p184_p1)
}
  0x22   :  { %33 = dma.hbm_to_vmem [thread:$0]  %s273_s1, 256, %s28_s24, [#allocation6], %s217_s19, %s217_s19, %s218_s20  }
  0x23   :  { %210 = dma.done.wait [#allocation3], 256  }
  0x24   :  { %211 = vsyncadd [#allocation3], 4294967040 }
  0x25   :  { %212 = dma.done.wait [#allocation6], 256  }
  0x26   :  { %213 = vsyncadd [#allocation6], 4294967040  ;;  %v40_v0 = vld [vmem:[#allocation2] sm:$0xff]  ;;  %v41_v1 = vld [vmem:[#allocation2 + $0x8] sm:$0xff]  ;;  %s220_s1 = smov [#allocation7]  }
  0x27   :  { %v44_v2 = vand.u32 2147483647, %v40_v0  ;;  %v45_v3 = vand.u32 2147483647, %v41_v1  ;;  %vm82_vm0 = vcmp.ge.f32.partialorder %v40_v0, 0.0  ;;  %v42_v14 = vld [vmem:[#allocation5] sm:$0xff] }
  0x28   :  { %vm83_vm1 = vcmp.ge.f32.partialorder %v41_v1, 0.0  ;;  %v43_v16 = vld [vmem:[#allocation5 + $0x8] sm:$0xff]  ;;  %v52_v36 = vmax.f32 %v40_v0, 0.0  ;;  %v54_v37 = vmul.f32 %v42_v14, %v40_v0  ;;  %v53_v38 = vmax.f32 %v41_v1, 0.0  ;;  %s111_s6 = sshll.u32 %s220_s1, 4  ;;  %s112_s6 = int_to_ptr.vmem [resolvable:$true] %s111_s6 }
  0x29   :  { %v46_v4 = vsub.f32 0.0, %v44_v2  ;;  %v47_v5 = vsub.f32 0.0, %v45_v3  ;;  %v55_v39 = vmul.f32 %v43_v16, %v41_v1  ;;  %s188_s7 = scalar_lea.vmem %s112_s6, 128  ;;  %p193_p3 = scmp.lt.s32.totalorder %s112_s6, %s112_s6 }
  0x2a   :  { %v56_v44 = vsub.f32 %v52_v36, %v54_v37  ;;  %p189_p2 = scmp.ne.s32.totalorder %s112_s6, %s188_s7  ;;  %p194_p4 = scmp.lt.s32.totalorder %s188_s7, %s188_s7 }
  0x2b   :  { %v48_v6 = vmul.f32 1.442695, %v46_v4  ;;  %v50_v7 = vmul.f32 1.442695, %v47_v5  ;;  %v57_v45 = vsub.f32 %v53_v38, %v55_v39 }
  0x2c   :  { %p195_p5 = por %p194_p4, %p193_p3 }
  0x2d   :  { %128 = vpow2.f32 %v48_v6 }
  0x2e   :  { %130 = vpow2.f32 %v50_v7  ;;  %p196_p6 = pnand %p195_p5, %p189_p2 }
  0x37   :  { %v129_v8 = vpop.eup %128 }
  0x38   :  { %v131_v9 = vpop.eup %130  ;;  %v58_v10 = vadd.f32 1.0, %v129_v8  ;;  %v61_v22 = vmul.f32 -0.5, %v129_v8  ;;  %v64_v31 = vand.u32 2147483647, %v129_v8 }
  0x39   :  { %v67_v11 = vadd.f32 1.0, %v131_v9  ;;  %v70_v24 = vmul.f32 -0.5, %v131_v9  ;;  %v73_v35 = vand.u32 2147483647, %v131_v9 }
  0x3a   :  { %132 = vrcp.f32 %v58_v10  ;;  %v62_v28 = vadd.f32 1.0, %v61_v22  ;;  %vm65_vm2 = vcmp.lt.f32.partialorder %v64_v31, 0.0004427343 }
  0x3b   :  { %134 = vrcp.f32 %v67_v11  ;;  %v71_v32 = vadd.f32 1.0, %v70_v24  ;;  %vm74_vm3 = vcmp.lt.f32.partialorder %v73_v35, 0.0004427343 }
  0x3c   :  { %136 = vlog2.f32 %v58_v10  ;;  %v63_v41 = vmul.f32 %v129_v8, %v62_v28 }
  0x3d   :  { %138 = vlog2.f32 %v67_v11  ;;  %v72_v43 = vmul.f32 %v131_v9, %v71_v32 }
  0x44   :  { %v133_v12 = vpop.eup %132 }
  0x45   :  { %v135_v13 = vpop.eup %134  ;;  %v84_v15 = vsub.f32 1.0, %v133_v12 }
  0x46   :  { %v85_v17 = vsub.f32 1.0, %v135_v13  ;;  %v137_v30 = vpop.eup %136 }
  0x47   :  { %v86_v18 = vsel %vm82_vm0, %v133_v12, %v84_v15  ;;  %v139_v34 = vpop.eup %138  ;;  %v60_v40 = vmul.f32 0.6931472, %v137_v30 }
  0x48   :  { %v87_v19 = vsel %vm83_vm1, %v135_v13, %v85_v17  ;;  %v88_v20 = vsub.f32 %v86_v18, %v42_v14  ;;  %v69_v42 = vmul.f32 0.6931472, %v139_v34 }
  0x49   :  { %v89_v21 = vsub.f32 %v87_v19, %v43_v16  ;;  %v66_v46 = vsel %vm65_vm2, %v63_v41, %v60_v40 }
  0x4a   :  { %v121_v23 = vadd.f32 -1.0, %v88_v20  ;;  %v75_v47 = vsel %vm74_vm3, %v72_v43, %v69_v42  ;;  %v76_v48 = vadd.f32 %v66_v46, %v56_v44 }
  0x4b   :  { %v122_v25 = vadd.f32 -1.0, %v89_v21  ;;  %v77_v50 = vadd.f32 %v75_v47, %v57_v45 }
  0x4c   :  { %v93_v26 = vmul.f32 19.960081, %v121_v23 }
  0x4d   :  { %v94_v27 = vmul.f32 19.960081, %v122_v25 }
  0x4e   :  { %v95_v29 = vmul.f32 1.442695, %v93_v26 }
  0x4f   :  { %v97_v33 = vmul.f32 1.442695, %v94_v27 }
  0x50   :  { %140 = vpow2.f32 %v95_v29 }
  0x51   :  { %142 = vpow2.f32 %v97_v33 }
  0x5a   :  { %v141_v49 = vpop.eup %140 }
  0x5b   :  { %v143_v51 = vpop.eup %142  ;;  %v99_v52 = vsub.f32 1.0, %v141_v49 }
  0x5c   :  { %v100_v53 = vsub.f32 1.0, %v143_v51 }
  0x5d   :  { %v101_v54 = vmul.f32 %v99_v52, %v76_v48 }
  0x5e   :  { %v102_v55 = vmul.f32 %v100_v53, %v77_v50 }
  0x60   :  { %v103_v56 = vadd.f32 %v102_v55, %v101_v54 }
  0x62   :  { %104 = vst [vmem:[#allocation7] sm:$0xff] %v103_v56 }
  0x63   :  { %199 = shalt.err (!%p196_p6)
}
  0x64   :  { %s200_s10 = scalar_lea.hbm %s274_s2, 128 }
  0x65   :  { %p201_p7 = scmp.ne.s32.totalorder %s274_s2, %s200_s10  ;;  %p204_p8 = scmp.lt.u32.totalorder %s200_s10, %s274_s2 }
  0x67   :  { %p206_p9 = pnand %p204_p8, %p201_p7 }
  0x69   :  { %209 = shalt.err (!%p206_p9)
}
  0x6a   :  { %114 = dma.vmem_to_hbm [thread:$0]  %s112_s6, 128, %s274_s2, [#allocation4]  }
  0x6b   :  { %214 = dma.done.wait [#allocation4], 128  }
  0x6c   :  { %215 = vsyncadd [#allocation4], 4294967168 }
  0x6d   :  { %118 = vsyncpa [#allocation3], 1 }
  0x6e   :  { %119 = vsyncpa [#allocation6], 1 }
  0x6f   :  { %120 = vsyncpa [#allocation4], 1 }

</bundles_post_ra>
